<compile_context>
chip_gen: v7x
topology: tpu7x:2x2x1
jax: 0.10.0
libtpu: 0.0.40
codegen_flags: <defaults>
</compile_context>

<pallas_src>
from functools import partial

import jax
import jax.numpy as jnp
from jax import lax
from jax.experimental import pallas as pl
from jax.experimental.pallas import tpu as pltpu


def linear_relu_kernel(x_ref, w_ref, b_ref, o_ref):
    # y = relu(x @ W^T + b); the x+x doubling is pre-folded into W and b.
    x = x_ref[...]          # (TB, IN)
    w = w_ref[...]          # (OUT, IN) — already scaled by 2 in the wrapper
    b = b_ref[...]          # (1, OUT)  — already scaled by 2 in the wrapper
    # Contract on the last dim of both operands: (TB, IN) x (OUT, IN) -> (TB, OUT).
    # No w.T, so no XLU transpose / vreg relayout inside the kernel.
    y = lax.dot_general(
        x, w,
        dimension_numbers=(((1,), (1,)), ((), ())),
        preferred_element_type=jnp.float32,
    )
    y = jnp.maximum(y + b, 0.0)
    o_ref[...] = y.astype(o_ref.dtype)


@partial(jax.jit, static_argnames=("block_b",))
def model_forward(x, weight, bias, block_b=512):
    """x: (B, 10) f32; weight: (10, 10); bias: (10,). Returns flattened (B*10,)."""
    B, IN = x.shape
    OUT = weight.shape[0]

    # Fold the `y = y + y` into the (constant) parameters — relu is
    # positively homogeneous, and scaling by 2 is exact in fp32.
    w2 = (2.0 * weight).astype(x.dtype)           # (OUT, IN)
    b2 = (2.0 * bias).reshape(1, OUT).astype(x.dtype)

    # Tile the batch dimension; keep f32 sublane (8) alignment when tiling.
    tb = min(block_b, B)
    if tb < B and tb % 8 != 0:
        tb = max(8, (tb // 8) * 8)
    grid = (pl.cdiv(B, tb),)

    out2d = pl.pallas_call(
        linear_relu_kernel,
        out_shape=jax.ShapeDtypeStruct((B, OUT), x.dtype),
        grid=grid,
        in_specs=[
            pl.BlockSpec((tb, IN), lambda i: (i, 0)),    # x tiles stream in
            pl.BlockSpec((OUT, IN), lambda i: (0, 0)),   # weight VMEM-resident
            pl.BlockSpec((1, OUT), lambda i: (0, 0)),    # bias VMEM-resident
        ],
        out_specs=pl.BlockSpec((tb, OUT), lambda i: (i, 0)),
        compiler_params=pltpu.CompilerParams(
            dimension_semantics=("parallel",),           # shard batch over TCs (v7x)
        ),
    )(x, w2, b2)

    # Tensor.flatten() — contiguous row-major, fuses to a bitcast under jit.
    return out2d.reshape(-1)


if __name__ == "__main__":
    key = jax.random.PRNGKey(0)
    kx, kw, kb = jax.random.split(key, 3)

    B, IN, OUT = 8, 10, 10
    x = jax.random.normal(kx, (B, IN), dtype=jnp.float32)
    # Deterministic synthetic parameters (nn.Linear(10, 10) shapes).
    weight = jax.random.normal(kw, (OUT, IN), dtype=jnp.float32) * 0.1
    bias = jax.random.normal(kb, (OUT,), dtype=jnp.float32) * 0.1

    out = model_forward(x, weight, bias)
    jax.block_until_ready(out)

    # Pure-JAX reference check (original op order: linear -> relu -> x+x -> flatten).
    ref = jnp.maximum(x @ weight.T + bias, 0.0)
    ref = (ref + ref).reshape(-1)
    assert out.shape == (B * OUT,)
    assert jnp.allclose(out, ref, atol=1e-5, rtol=1e-5)

    print("KERNEL_OK")
</pallas_src>

<mosaic_0001>
module attributes {stable_mosaic.version = 11 : i64} {
  func.func @linear_relu_kernel(%arg0: i32, %arg1: memref<8x10xf32, #tpu.memory_space<vmem>>, %arg2: memref<10x10xf32, #tpu.memory_space<vmem>>, %arg3: memref<1x10xf32, #tpu.memory_space<vmem>>, %arg4: memref<8x10xf32, #tpu.memory_space<vmem>>) attributes {dimension_semantics = [#tpu.dimension_semantics<parallel>], iteration_bounds = array<i64: 1>, scalar_prefetch = 0 : i64, scratch_operands = 0 : i64, tpu.core_type = #tpu.core_type<tc>, window_params = [{transform_indices = @transform_0, window_bounds = array<i64: 8, 10>}, {pipeline_mode = #tpu.pipeline_mode<synchronous>, transform_indices = @transform_1, window_bounds = array<i64: 10, 10>}, {pipeline_mode = #tpu.pipeline_mode<synchronous>, transform_indices = @transform_2, window_bounds = array<i64: 1, 10>}, {transform_indices = @transform_3, window_bounds = array<i64: 8, 10>}]} {
    %c0 = arith.constant 0 : index
    %c0_0 = arith.constant 0 : index
    %0 = vector.load %arg1[%c0, %c0_0] : memref<8x10xf32, #tpu.memory_space<vmem>>, vector<8x10xf32>
    %c0_1 = arith.constant 0 : index
    %c0_2 = arith.constant 0 : index
    %1 = vector.load %arg2[%c0_1, %c0_2] : memref<10x10xf32, #tpu.memory_space<vmem>>, vector<10x10xf32>
    %c0_3 = arith.constant 0 : index
    %c0_4 = arith.constant 0 : index
    %2 = vector.load %arg3[%c0_3, %c0_4] : memref<1x10xf32, #tpu.memory_space<vmem>>, vector<1x10xf32>
    %cst = arith.constant dense<0.000000e+00> : vector<8x10xf32>
    %3 = tpu.matmul %0, %1, %cst {dimension_numbers = #tpu.dot_dimension_numbers<[1], [1], [0], [0], [0, 0, 1, 0], [], []>} : vector<8x10xf32>, vector<10x10xf32>, vector<8x10xf32> -> vector<8x10xf32>
    %4 = vector.broadcast %2 : vector<1x10xf32> to vector<8x10xf32>
    %5 = arith.addf %3, %4 : vector<8x10xf32>
    %cst_5 = arith.constant 0.000000e+00 : f32
    %6 = vector.broadcast %cst_5 : f32 to vector<8x10xf32>
    %7 = arith.maximumf %5, %6 : vector<8x10xf32>
    %c0_6 = arith.constant 0 : index
    %c0_7 = arith.constant 0 : index
    %8 = vector.load %arg4[%c0_6, %c0_7] : memref<8x10xf32, #tpu.memory_space<vmem>>, vector<8x10xf32>
    tpu.vector_store %arg4[%c0_6, %c0_7], %7 {strides = array<i32>} : memref<8x10xf32, #tpu.memory_space<vmem>>, vector<8x10xf32>,
    return
  }
  func.func @transform_0(%arg0: i32) -> (i32, i32) {
    %c0_i32 = arith.constant 0 : i32
    %c0_i32_0 = arith.constant 0 : i32
    return %arg0, %c0_i32 : i32, i32
  }
  func.func @transform_1(%arg0: i32) -> (i32, i32) {
    %c0_i32 = arith.constant 0 : i32
    %c0_i32_0 = arith.constant 0 : i32
    %c0_i32_1 = arith.constant 0 : i32
    return %c0_i32, %c0_i32_0 : i32, i32
  }
  func.func @transform_2(%arg0: i32) -> (i32, i32) {
    %c0_i32 = arith.constant 0 : i32
    %c0_i32_0 = arith.constant 0 : i32
    %c0_i32_1 = arith.constant 0 : i32
    return %c0_i32, %c0_i32_0 : i32, i32
  }
  func.func @transform_3(%arg0: i32) -> (i32, i32) {
    %c0_i32 = arith.constant 0 : i32
    %c0_i32_0 = arith.constant 0 : i32
    return %arg0, %c0_i32 : i32, i32
  }
}

</mosaic_0001>

<bundles_post_ra>
// kernel: model_forward.1
= control target key start
LH: loop header
LB: loop body
LE: loop exit
PB: predicated region body
PF: predicated region fallthrough
CT: control target
= control target key end

     0   :  { %vm24_vm0 = vcmask 80896   ;;  %v131_v0 = vmov 0.0|0.0   ;;  %vm132_vm2 = vmmov 0   ;;  %v133_v3 = vmov 0.0   ;;  %s173_s1 = inlined_call_operand.vmem [shape: f32[10,10], index: 1, kind: input, shape index: {}]   ;;  %s174_s0 = inlined_call_operand.vmem [shape: f32[8,10], index: 0, kind: input, shape index: {}]   ;;  %s175_s2 = inlined_call_operand.vmem [shape: f32[1,10], index: 2, kind: input, shape index: {}]   ;;  %s176_s3 = inlined_call_operand.vmem [shape: f32[8,10], index: 3, kind: output, shape index: {}]  }
   0x1   :  { %124 = vmatprep.subr.bf16.mxu0 %v131_v0  ;;  %v15_v1 = vld [vmem:[%s173_s1] sm:$0xff]  ;;  %v16_v2 = vld [vmem:[%s173_s1 + $0x8] sm:$0x3]  ;;  %vm126_vm1 = vmpackc.low %vm24_vm0, %vm24_vm0  ;;  %121 = vmatprep.mubr.msk.f32.mxu0 %vm132_vm2, %v133_v3 }
   0x2   :  { %v125_v4 = vpack.c.bf16 %v16_v2, %v15_v1  ;;  %v14_v5 = vld [vmem:[%s174_s0] sm:$0xff] }
   0x3   :  { %v110_v6 = vld [vmem:[%s175_s2] ss:$0 sm:$0xff] }
   0x4   :  { %127 = vmatpush3.bf16.xpose.msk.msra.mxu0 %vm126_vm1, %v125_v4 }
   0xb   :  { %122 = vmatmul.mubr.msk.f32.vlgmr.msra.gmra.mrb[0].mxu0 %vm24_vm0, %v14_v5 }
  0xde   :  { %v100_v7 = vpop.f32.mrb[0].mxu0 }
  0xdf   :  { %v101_v8 = vadd.f32 %v110_v6, %v100_v7  ;;  %v123_v9 = vpop.f32.mrb[1].mxu0 }
  0xe1   :  { %v104_v10 = vmax.f32 %v101_v8, 0.0 }
  0xe3   :  { %105 = vst.msk [vmem:[%s176_s3] sm:$0xff] %vm24_vm0, %v104_v10 }

</bundles_post_ra>
